<compile_context>
chip_gen: v7x
topology: tpu7x:2x2x1
jax: 0.10.0
libtpu: 0.0.40
codegen_flags: <defaults>
</compile_context>

<pallas_src>
import jax
import jax.numpy as jnp
from jax.experimental import pallas as pl
from jax.experimental.pallas import tpu as pltpu


def _attention_kernel(img_ref, hid_ref, Uw_ref, Ub_ref, Ww_ref, Wb_ref,
                      vw_ref, vb_ref, ctx_ref, alpha_ref):
    B, L, E = img_ref.shape
    H = Uw_ref.shape[1]

    img = img_ref[...]                                    # (B, L, E) f32
    hid = hid_ref[...]                                    # (B, H)    f32

    # Batched U projection: bf16 x bf16 MXU, f32 accumulation.  (B, H)
    U_h = jnp.dot(hid.astype(jnp.bfloat16), Uw_ref[...],
                  preferred_element_type=jnp.float32) + Ub_ref[...]

    # Batched W projection over all B*L regions: (B*L, E) @ (E, H) -> (B*L, H)
    # (L=16 multiple of 8, E=128 -> the reshape is a free tile-aligned view.)
    W_s = jnp.dot(img.reshape(B * L, E).astype(jnp.bfloat16), Ww_ref[...],
                  preferred_element_type=jnp.float32) + Wb_ref[...]

    # att = tanh(W_s + U_h), U_h broadcast over the region axis — f32 VPU/EUP.
    att = jnp.tanh(W_s.reshape(B, L, H) + U_h[:, None, :])       # (B, L, H)

    # e = att @ v^T + b_v as a lane reduction (avoid an N=1 matmul) -> (B, L)
    e = jnp.sum(att * vw_ref[...].reshape(1, 1, H), axis=-1) + vb_ref[0]

    # softmax over the region axis (PyTorch Softmax(dim=1)), max-stabilized.
    e_max = jnp.max(e, axis=1, keepdims=True)
    p = jnp.exp(e - e_max)
    alpha = p / jnp.sum(p, axis=1, keepdims=True)                 # (B, L)

    # context = sum_l alpha_l * img_l -> (B, E), f32.
    ctx = jnp.sum(img * alpha[:, :, None], axis=1)

    ctx_ref[...] = ctx.astype(ctx_ref.dtype)
    alpha_ref[...] = alpha.astype(alpha_ref.dtype)


def prepare_attention_params(params):
    """One-time prep: (out,in)->(in,out) transpose + bf16 cast of MXU weights.

    Call this ONCE per module (outside the decode-step loop) so the per-call
    path never re-transposes or re-casts the ~1.25 MiB of weights.
    """
    H = params["U_w"].shape[0]
    return {
        "Uw_t": jnp.asarray(params["U_w"]).T.astype(jnp.bfloat16),   # (H, H)
        "Ub":   jnp.asarray(params["U_b"], jnp.float32).reshape(1, H),
        "Ww_t": jnp.asarray(params["W_w"]).T.astype(jnp.bfloat16),   # (E, H)
        "Wb":   jnp.asarray(params["W_b"], jnp.float32).reshape(1, H),
        "vw":   jnp.asarray(params["v_w"], jnp.float32).reshape(1, H),
        "vb":   jnp.asarray(params["v_b"], jnp.float32).reshape(1),  # SMEM scalar
    }


@jax.jit
def attention_forward(img_features, hidden_state, prepared):
    """img_features: (B, L, E) f32, hidden_state: (B, 512) f32."""
    B, L, E = img_features.shape
    H = hidden_state.shape[1]

    vmem = pl.BlockSpec(memory_space=pltpu.MemorySpace.VMEM)
    smem = pl.BlockSpec(memory_space=pltpu.MemorySpace.SMEM)

    ctx, alpha = pl.pallas_call(
        _attention_kernel,
        out_shape=(
            jax.ShapeDtypeStruct((B, E), jnp.float32),
            jax.ShapeDtypeStruct((B, L), jnp.float32),
        ),
        in_specs=[
            vmem,   # img_features (B, L, E) f32
            vmem,   # hidden_state (B, H)    f32
            vmem,   # U weight (H, H) bf16
            vmem,   # U bias   (1, H) f32
            vmem,   # W weight (E, H) bf16
            vmem,   # W bias   (1, H) f32
            vmem,   # v weight (1, H) f32
            smem,   # v bias   (1,)   f32 scalar
        ],
        out_specs=(vmem, vmem),
    )(img_features, hidden_state, prepared["Uw_t"], prepared["Ub"],
      prepared["Ww_t"], prepared["Wb"], prepared["vw"], prepared["vb"])
    return ctx, alpha


def attention_reference(img_features, hidden_state, params):
    """Pure-JAX f32 reference mirroring the PyTorch module."""
    U_h = hidden_state @ params["U_w"].T + params["U_b"]            # (B, H)
    W_s = img_features @ params["W_w"].T + params["W_b"]            # (B, L, H)
    att = jnp.tanh(W_s + U_h[:, None, :])
    e = (att @ params["v_w"].T + params["v_b"])[..., 0]             # (B, L)
    alpha = jax.nn.softmax(e, axis=1)
    ctx = jnp.sum(img_features * alpha[..., None], axis=1)
    return ctx, alpha


if __name__ == "__main__":
    B, L, E, H = 2, 16, 128, 512   # encoder_dim = 128; H fixed at 512 by module

    key = jax.random.PRNGKey(0)
    keys = jax.random.split(key, 8)

    params = {
        "U_w": jax.random.normal(keys[0], (H, H), jnp.float32) * 0.05,
        "U_b": jax.random.normal(keys[1], (H,), jnp.float32) * 0.05,
        "W_w": jax.random.normal(keys[2], (H, E), jnp.float32) * 0.05,
        "W_b": jax.random.normal(keys[3], (H,), jnp.float32) * 0.05,
        "v_w": jax.random.normal(keys[4], (1, H), jnp.float32) * 0.05,
        "v_b": jax.random.normal(keys[5], (1,), jnp.float32) * 0.05,
    }

    img_features = jax.random.normal(keys[6], (B, L, E), jnp.float32)
    hidden_state = jax.random.normal(keys[7], (B, H), jnp.float32)

    # One-time weight prep (transpose + bf16 cast), materialized up front.
    prepared = jax.block_until_ready(prepare_attention_params(params))

    ctx, alpha = attention_forward(img_features, hidden_state, prepared)
    jax.block_until_ready((ctx, alpha))

    # Correctness vs. f32 reference — tolerances loosened for the bf16 MXU
    # operands (weights quantized to ~3 decimal digits).
    ctx_ref, alpha_ref = attention_reference(img_features, hidden_state, params)
    assert jnp.allclose(ctx, ctx_ref, atol=3e-2, rtol=3e-2), "context mismatch"
    assert jnp.allclose(alpha, alpha_ref, atol=1e-2, rtol=3e-2), "alpha mismatch"
    assert jnp.allclose(alpha.sum(axis=1), 1.0, atol=1e-5), "alpha not normalized"

    print("KERNEL_OK")
</pallas_src>

<mosaic_0001>
module attributes {stable_mosaic.version = 11 : i64} {
  func.func @_attention_kernel(%arg0: memref<2x16x128xf32, #tpu.memory_space<vmem>>, %arg1: memref<2x512xf32, #tpu.memory_space<vmem>>, %arg2: memref<512x512xbf16, #tpu.memory_space<vmem>>, %arg3: memref<1x512xf32, #tpu.memory_space<vmem>>, %arg4: memref<128x512xbf16, #tpu.memory_space<vmem>>, %arg5: memref<1x512xf32, #tpu.memory_space<vmem>>, %arg6: memref<1x512xf32, #tpu.memory_space<vmem>>, %arg7: memref<1xf32, #tpu.memory_space<smem>>, %arg8: memref<2x128xf32, #tpu.memory_space<vmem>>, %arg9: memref<2x16xf32, #tpu.memory_space<vmem>>) attributes {dimension_semantics = [], scalar_prefetch = 0 : i64, scratch_operands = 0 : i64, tpu.core_type = #tpu.core_type<tc>} {
    %c0 = arith.constant 0 : index
    %c0_0 = arith.constant 0 : index
    %c0_1 = arith.constant 0 : index
    %0 = vector.load %arg0[%c0, %c0_0, %c0_1] : memref<2x16x128xf32, #tpu.memory_space<vmem>>, vector<2x16x128xf32>
    %c0_2 = arith.constant 0 : index
    %c0_3 = arith.constant 0 : index
    %1 = vector.load %arg1[%c0_2, %c0_3] : memref<2x512xf32, #tpu.memory_space<vmem>>, vector<2x512xf32>
    %2 = arith.truncf %1 : vector<2x512xf32> to vector<2x512xbf16>
    %c0_4 = arith.constant 0 : index
    %c0_5 = arith.constant 0 : index
    %3 = vector.load %arg2[%c0_4, %c0_5] : memref<512x512xbf16, #tpu.memory_space<vmem>>, vector<512x512xbf16>
    %cst = arith.constant dense<0.000000e+00> : vector<2x512xf32>
    %4 = tpu.matmul %2, %3, %cst {dimension_numbers = #tpu.dot_dimension_numbers<[1], [0], [0], [1], [0, 0, 1, 1], [], []>} : vector<2x512xbf16>, vector<512x512xbf16>, vector<2x512xf32> -> vector<2x512xf32>
    %c0_6 = arith.constant 0 : index
    %c0_7 = arith.constant 0 : index
    %5 = vector.load %arg3[%c0_6, %c0_7] : memref<1x512xf32, #tpu.memory_space<vmem>>, vector<1x512xf32>
    %6 = vector.broadcast %5 : vector<1x512xf32> to vector<2x512xf32>
    %7 = arith.addf %4, %6 : vector<2x512xf32>
    %8 = vector.shape_cast %0 : vector<2x16x128xf32> to vector<32x128xf32>
    %9 = arith.truncf %8 : vector<32x128xf32> to vector<32x128xbf16>
    %c0_8 = arith.constant 0 : index
    %c0_9 = arith.constant 0 : index
    %10 = vector.load %arg4[%c0_8, %c0_9] : memref<128x512xbf16, #tpu.memory_space<vmem>>, vector<128x512xbf16>
    %cst_10 = arith.constant dense<0.000000e+00> : vector<32x512xf32>
    %11 = tpu.matmul %9, %10, %cst_10 {dimension_numbers = #tpu.dot_dimension_numbers<[1], [0], [0], [1], [0, 0, 1, 1], [], []>} : vector<32x128xbf16>, vector<128x512xbf16>, vector<32x512xf32> -> vector<32x512xf32>
    %c0_11 = arith.constant 0 : index
    %c0_12 = arith.constant 0 : index
    %12 = vector.load %arg5[%c0_11, %c0_12] : memref<1x512xf32, #tpu.memory_space<vmem>>, vector<1x512xf32>
    %13 = vector.broadcast %12 : vector<1x512xf32> to vector<32x512xf32>
    %14 = arith.addf %11, %13 : vector<32x512xf32>
    %15 = vector.shape_cast %14 : vector<32x512xf32> to vector<2x16x512xf32>
    %16 = vector.shape_cast %7 : vector<2x512xf32> to vector<2x1x512xf32>
    %17 = vector.broadcast %16 : vector<2x1x512xf32> to vector<2x16x512xf32>
    %18 = arith.addf %15, %17 : vector<2x16x512xf32>
    %19 = math.tanh %18 : vector<2x16x512xf32>
    %c0_13 = arith.constant 0 : index
    %c0_14 = arith.constant 0 : index
    %20 = vector.load %arg6[%c0_13, %c0_14] : memref<1x512xf32, #tpu.memory_space<vmem>>, vector<1x512xf32>
    %21 = vector.shape_cast %20 : vector<1x512xf32> to vector<1x1x512xf32>
    %22 = vector.broadcast %21 : vector<1x1x512xf32> to vector<2x16x512xf32>
    %23 = arith.mulf %19, %22 : vector<2x16x512xf32>
    %cst_15 = arith.constant dense<0.000000e+00> : vector<2x16xf32>
    %24 = vector.multi_reduction <add>, %23, %cst_15 [2] : vector<2x16x512xf32> to vector<2x16xf32>
    %c0_16 = arith.constant 0 : index
    %25 = memref.load %arg7[%c0_16] : memref<1xf32, #tpu.memory_space<smem>>
    %26 = vector.broadcast %25 : f32 to vector<2x16xf32>
    %27 = arith.addf %24, %26 : vector<2x16xf32>
    %cst_17 = arith.constant dense<0xFF800000> : vector<2xf32>
    %28 = vector.multi_reduction <maximumf>, %27, %cst_17 [1] : vector<2x16xf32> to vector<2xf32>
    %29 = vector.shape_cast %28 : vector<2xf32> to vector<2x1xf32>
    %30 = vector.broadcast %29 : vector<2x1xf32> to vector<2x16xf32>
    %31 = arith.subf %27, %30 : vector<2x16xf32>
    %32 = math.exp %31 : vector<2x16xf32>
    %cst_18 = arith.constant dense<0.000000e+00> : vector<2xf32>
    %33 = vector.multi_reduction <add>, %32, %cst_18 [1] : vector<2x16xf32> to vector<2xf32>
    %34 = vector.shape_cast %33 : vector<2xf32> to vector<2x1xf32>
    %35 = vector.broadcast %34 : vector<2x1xf32> to vector<2x16xf32>
    %36 = arith.divf %32, %35 : vector<2x16xf32>
    %37 = vector.shape_cast %36 : vector<2x16xf32> to vector<2x16x1xf32>
    %38 = vector.broadcast %37 : vector<2x16x1xf32> to vector<2x16x128xf32>
    %39 = arith.mulf %0, %38 : vector<2x16x128xf32>
    %cst_19 = arith.constant dense<0.000000e+00> : vector<2x128xf32>
    %40 = vector.multi_reduction <add>, %39, %cst_19 [1] : vector<2x16x128xf32> to vector<2x128xf32>
    %c0_20 = arith.constant 0 : index
    %c0_21 = arith.constant 0 : index
    %41 = vector.load %arg8[%c0_20, %c0_21] : memref<2x128xf32, #tpu.memory_space<vmem>>, vector<2x128xf32>
    tpu.vector_store %arg8[%c0_20, %c0_21], %40 {strides = array<i32>} : memref<2x128xf32, #tpu.memory_space<vmem>>, vector<2x128xf32>,
    %c0_22 = arith.constant 0 : index
    %c0_23 = arith.constant 0 : index
    %42 = vector.load %arg9[%c0_22, %c0_23] : memref<2x16xf32, #tpu.memory_space<vmem>>, vector<2x16xf32>
    tpu.vector_store %arg9[%c0_22, %c0_23], %36 {strides = array<i32>} : memref<2x16xf32, #tpu.memory_space<vmem>>, vector<2x16xf32>,
    return
  }
}

</mosaic_0001>

<bundles_post_ra>
// kernel: attention_forward.1
= control target key start
LH: loop header
LB: loop body
LE: loop exit
PB: predicated region body
PF: predicated region fallthrough
CT: control target
= control target key end

     0   :  { %16 = vsyncpa [#allocation4], 0  ;;  %s2667_s0 = inlined_call_operand.hbm [shape: f32[2,16,128], index: 0, kind: input, shape index: {}]   ;;  %s2668_s1 = inlined_call_operand.hbm [shape: f32[2,512], index: 1, kind: input, shape index: {}]   ;;  %s2669_s2 = inlined_call_operand.hbm [shape: bf16[512,512], index: 2, kind: input, shape index: {}]   ;;  %s2670_s3 = inlined_call_operand.vmem [shape: f32[1,512], index: 3, kind: input, shape index: {}]   ;;  %s2671_s4 = inlined_call_operand.hbm [shape: bf16[128,512], index: 4, kind: input, shape index: {}]   ;;  %s2672_s5 = inlined_call_operand.vmem [shape: f32[1,512], index: 5, kind: input, shape index: {}]   ;;  %s2673_s6 = inlined_call_operand.vmem [shape: f32[1,512], index: 6, kind: input, shape index: {}]   ;;  %s2674_s7 = inlined_call_operand.<no memory space> [shape: f32[1], index: 7, kind: input, shape index: {}]   ;;  %s2675_s8 = inlined_call_operand.hbm [shape: f32[2,128], index: 8, kind: output, shape index: {0}]   ;;  %s2676_s9 = inlined_call_operand.hbm [shape: f32[2,16], index: 9, kind: output, shape index: {1}]  }
   0x1   :  { %17 = vsyncpa [#allocation7], 0 }
   0x2   :  { %18 = vsyncpa [#allocation10], 0 }
   0x3   :  { %19 = vsyncpa [#allocation5], 0 }
   0x4   :  { %20 = vsyncpa [#allocation13], 0  ;;  %s2388_s30 = smov [#allocation6]   ;;  %s2389_s11 = smov [#allocation3]  }
   0x5   :  { %s39_s10 = sshll.u32 %s2388_s30, 4  ;;  %s26_s12 = sshll.u32 %s2389_s11, 4  ;;  %s40_s10 = int_to_ptr.vmem [resolvable:$true] %s39_s10  ;;  %s2451_s12 = int_to_ptr.vmem [resolvable:$true] %s26_s12 }
   0x6   :  { %s2246_s15 = scalar_lea.hbm %s2668_s1, 128 }
   0x7   :  { %p2247_p0 = scmp.ne.s32.totalorder %s2668_s1, %s2246_s15  ;;  %p2250_p1 = scmp.lt.u32.totalorder %s2246_s15, %s2668_s1 }
   0x9   :  { %p2252_p2 = pnand %p2250_p1, %p2247_p0 }
   0xb   :  { %2255 = shalt.err (!%p2252_p2)
}
   0xc   :  { %s2256_s20 = scalar_lea.vmem %s40_s10, 128  ;;  %p2261_p4 = scmp.lt.s32.totalorder %s40_s10, %s40_s10 }
   0xd   :  { %p2257_p3 = scmp.ne.s32.totalorder %s40_s10, %s2256_s20  ;;  %p2262_p5 = scmp.lt.s32.totalorder %s2256_s20, %s2256_s20 }
   0xf   :  { %p2263_p6 = por %p2262_p5, %p2261_p4 }
  0x11   :  { %p2264_p7 = pnand %p2263_p6, %p2257_p3 }
  0x13   :  { %2267 = shalt.err (!%p2264_p7)
}
  0x14   :  { %42 = dma.hbm_to_vmem [thread:$0]  %s2668_s1, 128, %s40_s10, [#allocation7]  }
  0x15   :  { %s2268_s25 = scalar_lea.hbm %s2667_s0, 512 }
  0x16   :  { %p2269_p8 = scmp.ne.s32.totalorder %s2667_s0, %s2268_s25  ;;  %p2272_p9 = scmp.lt.u32.totalorder %s2268_s25, %s2667_s0 }
  0x18   :  { %p2274_p10 = pnand %p2272_p9, %p2269_p8 }
  0x1a   :  { %2277 = shalt.err (!%p2274_p10)
}
  0x1b   :  { %s2278_s30 = scalar_lea.vmem %s2451_s12, 512  ;;  %p2283_p12 = scmp.lt.s32.totalorder %s2451_s12, %s2451_s12 }
  0x1c   :  { %p2279_p11 = scmp.ne.s32.totalorder %s2451_s12, %s2278_s30  ;;  %p2284_p13 = scmp.lt.s32.totalorder %s2278_s30, %s2278_s30 }
  0x1e   :  { %p2285_p0 = por %p2284_p13, %p2283_p12 }
  0x20   :  { %p2286_p1 = pnand %p2285_p0, %p2279_p11 }
  0x22   :  { %2289 = shalt.err (!%p2286_p1)
}
  0x23   :  { %s2390_s1 = smov 128   ;;  %s2391_s10 = smov 8  }
  0x24   :  { %32 = dma.hbm_to_vmem [thread:$0]  %s2667_s0, 512, %s2451_s12, [#allocation4], %s2390_s1, %s2390_s1, %s2391_s10  }
  0x25   :  { %s2392_s14 = smov [#allocation8]   ;;  %s2290_s18 = scalar_lea.hbm %s2669_s2, 16384 }
  0x26   :  { %s48_s15 = sshll.u32 %s2392_s14, 4  ;;  %p2291_p2 = scmp.ne.s32.totalorder %s2669_s2, %s2290_s18  ;;  %s49_s15 = int_to_ptr.vmem [resolvable:$true] %s48_s15 }
  0x27   :  { %p2294_p3 = scmp.lt.u32.totalorder %s2290_s18, %s2669_s2 }
  0x29   :  { %p2296_p4 = pnand %p2294_p3, %p2291_p2 }
  0x2b   :  { %2299 = shalt.err (!%p2296_p4)
}
  0x2c   :  { %s2300_s23 = scalar_lea.vmem %s49_s15, 16384  ;;  %p2305_p6 = scmp.lt.s32.totalorder %s49_s15, %s49_s15 }
  0x2d   :  { %p2301_p5 = scmp.ne.s32.totalorder %s49_s15, %s2300_s23  ;;  %p2306_p7 = scmp.lt.s32.totalorder %s2300_s23, %s2300_s23 }
  0x2f   :  { %p2307_p8 = por %p2306_p7, %p2305_p6 }
  0x31   :  { %p2308_p9 = pnand %p2307_p8, %p2301_p5 }
  0x33   :  { %2311 = shalt.err (!%p2308_p9)
}
  0x34   :  { %s2393_s0 = smov 256   ;;  %s2394_s12 = smov 16  }
  0x35   :  { %54 = dma.hbm_to_vmem [thread:$0]  %s2669_s2, 16384, %s49_s15, [#allocation7], %s2393_s0, %s2393_s0, %s2394_s12  }
  0x36   :  { %s2395_s26 = smov [#allocation9]   ;;  %s2312_s30 = scalar_lea.hbm %s2671_s4, 4096 }
  0x37   :  { %s62_s27 = sshll.u32 %s2395_s26, 4  ;;  %p2313_p10 = scmp.ne.s32.totalorder %s2671_s4, %s2312_s30  ;;  %s63_s27 = int_to_ptr.vmem [resolvable:$true] %s62_s27 }
  0x38   :  { %p2316_p11 = scmp.lt.u32.totalorder %s2312_s30, %s2671_s4 }
  0x3a   :  { %p2318_p12 = pnand %p2316_p11, %p2313_p10 }
  0x3c   :  { %2321 = shalt.err (!%p2318_p12)
}
  0x3d   :  { %s2322_s14 = scalar_lea.vmem %s63_s27, 4096  ;;  %p2327_p0 = scmp.lt.s32.totalorder %s63_s27, %s63_s27 }
  0x3e   :  { %p2323_p13 = scmp.ne.s32.totalorder %s63_s27, %s2322_s14  ;;  %p2328_p1 = scmp.lt.s32.totalorder %s2322_s14, %s2322_s14 }
  0x40   :  { %p2329_p2 = por %p2328_p1, %p2327_p0 }
  0x42   :  { %p2330_p3 = pnand %p2329_p2, %p2323_p13 }
  0x44   :  { %2333 = shalt.err (!%p2330_p3)
}
  0x45   :  { %68 = dma.hbm_to_vmem [thread:$0]  %s2671_s4, 4096, %s63_s27, [#allocation10], %s2393_s0, %s2393_s0, %s2394_s12  }
  0x46   :  { %2378 = dma.done.wait [#allocation4], 512  }
  0x47   :  { %2379 = vsyncadd [#allocation4], 4294966784 }
  0x48   :  { %2380 = dma.done.wait [#allocation7], 16512  }
  0x49   :  { %2381 = vsyncadd [#allocation7], 4294950784 }
  0x4a   :  { %2382 = dma.done.wait [#allocation10], 4096  }
  0x4b   :  { %2383 = vsyncadd [#allocation10], 4294963200  ;;  %v1961_v0 = vld [vmem:[#allocation8 + $0x4] ss:$16 sps:$4 sm:$0xff]   ;;  %v1963_v1 = vld [vmem:[#allocation8 + $0xc] ss:$16 sps:$4 sm:$0xff]   ;;  %v98_v38 = vlaneseq }
  0x4c   :  { %909 = vmatprep.subr.bf16.mxu0 %v1961_v0  ;;  %v1965_v2 = vld [vmem:[#allocation8] ss:$16 sps:$4 sm:$0xff]   ;;  %v1966_v3 = vld [vmem:[#allocation8 + $0x8] ss:$16 sps:$4 sm:$0xff]   ;;  %991 = vmatprep.subr.bf16.mxu1 %v1963_v1  ;;  %v1967_v4 = vld [vmem:[#allocation8 + $0x24] ss:$16 sps:$4 sm:$0xff]  }
  0x4d   :  { %910 = vmatpush1.bf16.msra.mxu0 %v1965_v2  ;;  %992 = vmatpush1.bf16.msra.mxu1 %v1966_v3  ;;  %v1969_v5 = vld [vmem:[#allocation8 + $0x2c] ss:$16 sps:$4 sm:$0xff]   ;;  %v1971_v6 = vld [vmem:[#allocation8 + $0x20] ss:$16 sps:$4 sm:$0xff]   ;;  %v1972_v7 = vld [vmem:[#allocation8 + $0x28] ss:$16 sps:$4 sm:$0xff]  }
  0x4e   :  { %911 = vmatprep.subr.bf16.mxu0 %v1967_v4  ;;  %993 = vmatprep.subr.bf16.mxu1 %v1969_v5  ;;  %v1973_v8 = vld [vmem:[#allocation8 + $0x44] ss:$16 sps:$4 sm:$0xff]   ;;  %v1975_v9 = vld [vmem:[#allocation8 + $0x4c] ss:$16 sps:$4 sm:$0xff]   ;;  %v1977_v10 = vld [vmem:[#allocation8 + $0x40] ss:$16 sps:$4 sm:$0xff]  }
  0x4f   :  { %v1978_v11 = vld [vmem:[#allocation8 + $0x48] ss:$16 sps:$4 sm:$0xff]   ;;  %v1979_v12 = vld [vmem:[#allocation8 + $0x64] ss:$16 sps:$4 sm:$0xff]   ;;  %v1981_v13 = vld [vmem:[#allocation8 + $0x6c] ss:$16 sps:$4 sm:$0xff]  }
  0x50   :  { %v1983_v14 = vld [vmem:[#allocation8 + $0x60] ss:$16 sps:$4 sm:$0xff]   ;;  %v1984_v15 = vld [vmem:[#allocation8 + $0x68] ss:$16 sps:$4 sm:$0xff]   ;;  %v1985_v16 = vld [vmem:[#allocation8 + $0x84] ss:$16 sps:$4 sm:$0xff]  }
  0x51   :  { %912 = vmatpush1.bf16.msra.mxu0 %v1971_v6  ;;  %994 = vmatpush1.bf16.msra.mxu1 %v1972_v7  ;;  %v1987_v17 = vld [vmem:[#allocation8 + $0x8c] ss:$16 sps:$4 sm:$0xff]   ;;  %v1989_v18 = vld [vmem:[#allocation8 + $0x80] ss:$16 sps:$4 sm:$0xff]   ;;  %v1990_v19 = vld [vmem:[#allocation8 + $0x88] ss:$16 sps:$4 sm:$0xff]  }
  0x52   :  { %913 = vmatprep.subr.bf16.mxu0 %v1973_v8  ;;  %995 = vmatprep.subr.bf16.mxu1 %v1975_v9  ;;  %v1991_v20 = vld [vmem:[#allocation8 + $0xa4] ss:$16 sps:$4 sm:$0xff]   ;;  %v1993_v21 = vld [vmem:[#allocation8 + $0xac] ss:$16 sps:$4 sm:$0xff]   ;;  %v1995_v22 = vld [vmem:[#allocation8 + $0xa0] ss:$16 sps:$4 sm:$0xff]  }
  0x53   :  { %v1996_v23 = vld [vmem:[#allocation8 + $0xa8] ss:$16 sps:$4 sm:$0xff]   ;;  %v1997_v24 = vld [vmem:[#allocation8 + $0xc4] ss:$16 sps:$4 sm:$0xff]   ;;  %v1999_v25 = vld [vmem:[#allocation8 + $0xcc] ss:$16 sps:$4 sm:$0xff]  }
  0x54   :  { %v2001_v26 = vld [vmem:[#allocation8 + $0xc0] ss:$16 sps:$4 sm:$0xff]   ;;  %v2002_v27 = vld [vmem:[#allocation8 + $0xc8] ss:$16 sps:$4 sm:$0xff]   ;;  %v2003_v28 = vld [vmem:[#allocation8 + $0xe4] ss:$16 sps:$4 sm:$0xff]  }
  0x55   :  { %914 = vmatpush1.bf16.msra.mxu0 %v1977_v10  ;;  %996 = vmatpush1.bf16.msra.mxu1 %v1978_v11  ;;  %v2005_v29 = vld [vmem:[#allocation8 + $0xec] ss:$16 sps:$4 sm:$0xff]   ;;  %v2007_v30 = vld [vmem:[#allocation8 + $0xe0] ss:$16 sps:$4 sm:$0xff]   ;;  %v2008_v31 = vld [vmem:[#allocation8 + $0xe8] ss:$16 sps:$4 sm:$0xff]  }
  0x56   :  { %915 = vmatprep.subr.bf16.mxu0 %v1979_v12  ;;  %997 = vmatprep.subr.bf16.mxu1 %v1981_v13  ;;  %v2009_v32 = vld [vmem:[#allocation8 + $0x104] ss:$16 sps:$4 sm:$0xff]   ;;  %v2011_v33 = vld [vmem:[#allocation8 + $0x10c] ss:$16 sps:$4 sm:$0xff]   ;;  %v2013_v34 = vld [vmem:[#allocation8 + $0x100] ss:$16 sps:$4 sm:$0xff]  }
  0x57   :  { %v2014_v35 = vld [vmem:[#allocation8 + $0x108] ss:$16 sps:$4 sm:$0xff]   ;;  %v2396_v36 = vmov 1983009808   ;;  %v2015_v39 = vld [vmem:[#allocation8 + $0x124] ss:$16 sps:$4 sm:$0xff]  }
  0x58   :  { %v96_v37 = vunpack.c.l.s4 %v2396_v36  ;;  %v2017_v40 = vld [vmem:[#allocation8 + $0x12c] ss:$16 sps:$4 sm:$0xff]   ;;  %v2397_v41 = vmov 0   ;;  %v2019_v42 = vld [vmem:[#allocation8 + $0x120] ss:$16 sps:$4 sm:$0xff]   ;;  %v2509_v44 = vshrl.u32 %v98_v38, 7 }
  0x59   :  { %916 = vmatpush1.bf16.msra.mxu0 %v1983_v14  ;;  %998 = vmatpush1.bf16.msra.mxu1 %v1984_v15  ;;  %v2020_v45 = vld [vmem:[#allocation8 + $0x128] ss:$16 sps:$4 sm:$0xff]   ;;  %v2021_v46 = vld [vmem:[#allocation8 + $0x144] ss:$16 sps:$4 sm:$0xff]   ;;  %v2023_v47 = vld [vmem:[#allocation8 + $0x14c] ss:$16 sps:$4 sm:$0xff]  }
  0x5a   :  { %917 = vmatprep.subr.bf16.mxu0 %v1985_v16  ;;  %999 = vmatprep.subr.bf16.mxu1 %v1987_v17  ;;  %v97_v43 = vunpack.c.0.s8 %v96_v37  ;;  %v2025_v48 = vld [vmem:[#allocation8 + $0x140] ss:$16 sps:$4 sm:$0xff]   ;;  %v2026_v49 = vld [vmem:[#allocation8 + $0x148] ss:$16 sps:$4 sm:$0xff]   ;;  %v2027_v51 = vld [vmem:[#allocation8 + $0x164] ss:$16 sps:$4 sm:$0xff]  }
  0x5b   :  { %1960 = vset.pattern.permute.xlu0 %v2397_v41  ;;  %1959 = vset.pattern.permute.xlu1 %v2397_v41  ;;  %v2029_v52 = vld [vmem:[#allocation8 + $0x16c] ss:$16 sps:$4 sm:$0xff]   ;;  %v2031_v54 = vld [vmem:[#allocation8 + $0x160] ss:$16 sps:$4 sm:$0xff]   ;;  %v2032_v56 = vld [vmem:[#allocation8 + $0x168] ss:$16 sps:$4 sm:$0xff]  }
  0x5c   :  { %v100_v50 = vsub.s32 %v97_v43, %v2509_v44  ;;  %v92_v53 = vld [vmem:[#allocation6] sm:$0xff]  ;;  %v2033_v57 = vld [vmem:[#allocation8 + $0x184] ss:$16 sps:$4 sm:$0xff]   ;;  %v2037_v60 = vld [vmem:[#allocation8 + $0x180] ss:$16 sps:$4 sm:$0xff]   ;;  %vm1582_vm0 = vcmask 130112  }
  0x5d   :  { %918 = vmatpush1.bf16.msra.mxu0 %v1989_v18  ;;  %1000 = vmatpush1.bf16.msra.mxu1 %v1990_v19  ;;  %v2035_v58 = vld [vmem:[#allocation8 + $0x18c] ss:$16 sps:$4 sm:$0xff]   ;;  %v2038_v62 = vld [vmem:[#allocation8 + $0x188] ss:$16 sps:$4 sm:$0xff]   ;;  %v2039_v63 = vld [vmem:[#allocation8 + $0x1a4] ss:$16 sps:$4 sm:$0xff]   ;;  %v94_v5 = vcombine.high %v92_v53, %v92_v53 }
  0x5e   :  { %919 = vmatprep.subr.bf16.mxu0 %v1991_v20  ;;  %1001 = vmatprep.subr.bf16.mxu1 %v1993_v21  ;;  %v101_v55 = vrot.slane %v92_v53, %v100_v50  ;;  %v2041_v0 = vld [vmem:[#allocation8 + $0x1ac] ss:$16 sps:$4 sm:$0xff]   ;;  %v2043_v1 = vld [vmem:[#allocation8 + $0x1a0] ss:$16 sps:$4 sm:$0xff]   ;;  %v2044_v2 = vld [vmem:[#allocation8 + $0x1a8] ss:$16 sps:$4 sm:$0xff]  }
  0x5f   :  { %v2045_v3 = vld [vmem:[#allocation8 + $0x1c4] ss:$16 sps:$4 sm:$0xff]   ;;  %v2047_v4 = vld [vmem:[#allocation8 + $0x1cc] ss:$16 sps:$4 sm:$0xff]   ;;  %v2049_v6 = vld [vmem:[#allocation8 + $0x1c0] ss:$16 sps:$4 sm:$0xff]   ;;  %v2512_v10 = vrot.slane %v94_v5, %v100_v50 }
  0x60   :  { %v109_v59 = vcombine.high %v101_v55, %v101_v55  ;;  %v2050_v7 = vld [vmem:[#allocation8 + $0x1c8] ss:$16 sps:$4 sm:$0xff]   ;;  %v2051_v8 = vld [vmem:[#allocation8 + $0x1e4] ss:$16 sps:$4 sm:$0xff]   ;;  %v2053_v9 = vld [vmem:[#allocation8 + $0x1ec] ss:$16 sps:$4 sm:$0xff]   ;;  %v115_v17 = vpack.c.bf16 %v101_v55, %v101_v55 }
  0x61   :  { %920 = vmatpush1.bf16.msra.mxu0 %v1995_v22  ;;  %1002 = vmatpush1.bf16.msra.mxu1 %v1996_v23  ;;  %v2055_v11 = vld [vmem:[#allocation8 + $0x1e0] ss:$16 sps:$4 sm:$0xff]   ;;  %v2056_v12 = vld [vmem:[#allocation8 + $0x1e8] ss:$16 sps:$4 sm:$0xff]   ;;  %v2060_v13 = vld [vmem:[#allocation8 + $0x204] ss:$16 sps:$4 sm:$0xff]   ;;  %v110_v15 = vcombine.high %v2512_v10, %v2512_v10 }
  0x62   :  { %921 = vmatprep.subr.bf16.mxu0 %v1997_v24  ;;  %1003 = vmatprep.subr.bf16.mxu1 %v1999_v25  ;;  %v116_v61 = vpack.c.bf16 %v109_v59, %v109_v59  ;;  %v2063_v14 = vld [vmem:[#allocation8 + $0x20c] ss:$16 sps:$4 sm:$0xff]   ;;  %v2058_v16 = vld [vmem:[#allocation8 + $0x200] ss:$16 sps:$4 sm:$0xff]   ;;  %v2061_v18 = vld [vmem:[#allocation8 + $0x208] ss:$16 sps:$4 sm:$0xff]  }
  0x63   :  { %v2066_v19 = vld [vmem:[#allocation8 + $0x224] ss:$16 sps:$4 sm:$0xff]   ;;  %v2069_v20 = vld [vmem:[#allocation8 + $0x22c] ss:$16 sps:$4 sm:$0xff]   ;;  %v118_v21 = vpack.c.bf16 %v110_v15, %v110_v15  ;;  %v2064_v22 = vld [vmem:[#allocation8 + $0x220] ss:$16 sps:$4 sm:$0xff]  }
  0x64   :  { %941 = vmatprep.mubr.bf16.mxu0 %v116_v61  ;;  %1023 = vmatprep.mubr.bf16.mxu1 %v116_v61  ;;  %v2067_v23 = vld [vmem:[#allocation8 + $0x228] ss:$16 sps:$4 sm:$0xff]   ;;  %v2072_v24 = vld [vmem:[#allocation8 + $0x244] ss:$16 sps:$4 sm:$0xff]   ;;  %v2075_v25 = vld [vmem:[#allocation8 + $0x24c] ss:$16 sps:$4 sm:$0xff]  }
  0x65   :  { %922 = vmatpush1.bf16.msra.mxu0 %v2001_v26  ;;  %1004 = vmatpush1.bf16.msra.mxu1 %v2002_v27  ;;  %v2070_v26 = vld [vmem:[#allocation8 + $0x240] ss:$16 sps:$4 sm:$0xff]   ;;  %v2073_v27 = vld [vmem:[#allocation8 + $0x248] ss:$16 sps:$4 sm:$0xff]   ;;  %v2090_v36 = vld [vmem:[#allocation8 + $0x2a4] ss:$16 sps:$4 sm:$0xff]  }
  0x66   :  { %923 = vmatprep.subr.bf16.mxu0 %v2003_v28  ;;  %1005 = vmatprep.subr.bf16.mxu1 %v2005_v29  ;;  %v2078_v28 = vld [vmem:[#allocation8 + $0x264] ss:$16 sps:$4 sm:$0xff]   ;;  %v2081_v29 = vld [vmem:[#allocation8 + $0x26c] ss:$16 sps:$4 sm:$0xff]   ;;  %v2103_v50 = vld [vmem:[#allocation8 + $0x2e8] ss:$16 sps:$4 sm:$0xff]  }
  0x67   :  { %v2093_v37 = vld [vmem:[#allocation8 + $0x2ac] ss:$16 sps:$4 sm:$0xff]   ;;  %v2106_v53 = vld [vmem:[#allocation8 + $0x300] ss:$16 sps:$4 sm:$0xff]   ;;  %v2114_v55 = vld [vmem:[#allocation8 + $0x324] ss:$16 sps:$4 sm:$0xff]  }
  0x68   :  { %v2099_v43 = vld [vmem:[#allocation8 + $0x2cc] ss:$16 sps:$4 sm:$0xff]   ;;  %v2120_v59 = vld [vmem:[#allocation8 + $0x344] ss:$16 sps:$4 sm:$0xff]   ;;  %v2118_v61 = vld [vmem:[#allocation8 + $0x340] ss:$16 sps:$4 sm:$0xff]  }
  0x69   :  { %924 = vmatpush1.bf16.msra.mxu0 %v2007_v30  ;;  %1006 = vmatpush1.bf16.msra.mxu1 %v2008_v31  ;;  %v2076_v30 = vld [vmem:[#allocation8 + $0x260] ss:$16 sps:$4 sm:$0xff]   ;;  %v2079_v31 = vld [vmem:[#allocation8 + $0x268] ss:$16 sps:$4 sm:$0xff]   ;;  %vm1593_vm1 = vcmask 1041409   ;;  %vm1596_vm2 = vcmask 123904  }
  0x6a   :  { %925 = vmatprep.subr.bf16.mxu0 %v2009_v32  ;;  %1007 = vmatprep.subr.bf16.mxu1 %v2011_v33  ;;  %v2084_v32 = vld [vmem:[#allocation8 + $0x284] ss:$16 sps:$4 sm:$0xff]   ;;  %v2087_v33 = vld [vmem:[#allocation8 + $0x28c] ss:$16 sps:$4 sm:$0xff]   ;;  %v2130_v5 = vld [vmem:[#allocation8 + $0x380] ss:$16 sps:$4 sm:$0xff]  }
  0x6b   :  { %v2145_v15 = vld [vmem:[#allocation8 + $0x3c8] ss:$16 sps:$4 sm:$0xff]  }
  0x6d   :  { %926 = vmatpush1.bf16.msra.mxu0 %v2013_v34  ;;  %1008 = vmatpush1.bf16.msra.mxu1 %v2014_v35  ;;  %v2082_v34 = vld [vmem:[#allocation8 + $0x280] ss:$16 sps:$4 sm:$0xff]   ;;  %v2085_v35 = vld [vmem:[#allocation8 + $0x288] ss:$16 sps:$4 sm:$0xff]  }
  0x6e   :  { %927 = vmatprep.subr.bf16.mxu0 %v2015_v39  ;;  %1009 = vmatprep.subr.bf16.mxu1 %v2017_v40  ;;  %v2088_v39 = vld [vmem:[#allocation8 + $0x2a0] ss:$16 sps:$4 sm:$0xff]   ;;  %v2091_v40 = vld [vmem:[#allocation8 + $0x2a8] ss:$16 sps:$4 sm:$0xff]  }
  0x71   :  { %928 = vmatpush1.bf16.msra.mxu0 %v2019_v42  ;;  %1010 = vmatpush1.bf16.msra.mxu1 %v2020_v45  ;;  %v2096_v42 = vld [vmem:[#allocation8 + $0x2c4] ss:$16 sps:$4 sm:$0xff]   ;;  %v2094_v45 = vld [vmem:[#allocation8 + $0x2c0] ss:$16 sps:$4 sm:$0xff]  }
  0x72   :  { %929 = vmatprep.subr.bf16.mxu0 %v2021_v46  ;;  %1011 = vmatprep.subr.bf16.mxu1 %v2023_v47  ;;  %v2097_v46 = vld [vmem:[#allocation8 + $0x2c8] ss:$16 sps:$4 sm:$0xff]   ;;  %v2102_v47 = vld [vmem:[#allocation8 + $0x2e4] ss:$16 sps:$4 sm:$0xff]  }
  0x75   :  { %930 = vmatpush1.bf16.msra.mxu0 %v2025_v48  ;;  %1012 = vmatpush1.bf16.msra.mxu1 %v2026_v49  ;;  %v2105_v48 = vld [vmem:[#allocation8 + $0x2ec] ss:$16 sps:$4 sm:$0xff]   ;;  %v2100_v49 = vld [vmem:[#allocation8 + $0x2e0] ss:$16 sps:$4 sm:$0xff]  }
  0x76   :  { %931 = vmatprep.subr.bf16.mxu0 %v2027_v51  ;;  %1013 = vmatprep.subr.bf16.mxu1 %v2029_v52  ;;  %v2108_v51 = vld [vmem:[#allocation8 + $0x304] ss:$16 sps:$4 sm:$0xff]   ;;  %v2111_v52 = vld [vmem:[#allocation8 + $0x30c] ss:$16 sps:$4 sm:$0xff]  }
  0x79   :  { %932 = vmatpush1.bf16.msra.mxu0 %v2031_v54  ;;  %1014 = vmatpush1.bf16.msra.mxu1 %v2032_v56  ;;  %v2109_v54 = vld [vmem:[#allocation8 + $0x308] ss:$16 sps:$4 sm:$0xff]   ;;  %v2117_v56 = vld [vmem:[#allocation8 + $0x32c] ss:$16 sps:$4 sm:$0xff]  }
  0x7a   :  { %933 = vmatprep.subr.bf16.mxu0 %v2033_v57  ;;  %1015 = vmatprep.subr.bf16.mxu1 %v2035_v58  ;;  %v2112_v57 = vld [vmem:[#allocation8 + $0x320] ss:$16 sps:$4 sm:$0xff]   ;;  %v2115_v58 = vld [vmem:[#allocation8 + $0x328] ss:$16 sps:$4 sm:$0xff]  }
  0x7d   :  { %934 = vmatpush1.bf16.msra.mxu0 %v2037_v60  ;;  %1016 = vmatpush1.bf16.msra.mxu1 %v2038_v62  ;;  %v2123_v60 = vld [vmem:[#allocation8 + $0x34c] ss:$16 sps:$4 sm:$0xff]   ;;  %v2121_v62 = vld [vmem:[#allocation8 + $0x348] ss:$16 sps:$4 sm:$0xff]  }
  0x7e   :  { %935 = vmatprep.subr.bf16.mxu0 %v2039_v63  ;;  %1017 = vmatprep.subr.bf16.mxu1 %v2041_v0  ;;  %v2126_v63 = vld [vmem:[#allocation8 + $0x364] ss:$16 sps:$4 sm:$0xff]   ;;  %v2129_v0 = vld [vmem:[#allocation8 + $0x36c] ss:$16 sps:$4 sm:$0xff]  }
  0x81   :  { %936 = vmatpush1.bf16.msra.mxu0 %v2043_v1  ;;  %1018 = vmatpush1.bf16.msra.mxu1 %v2044_v2  ;;  %v2124_v1 = vld [vmem:[#allocation8 + $0x360] ss:$16 sps:$4 sm:$0xff]   ;;  %v2127_v2 = vld [vmem:[#allocation8 + $0x368] ss:$16 sps:$4 sm:$0xff]  }
  0x82   :  { %937 = vmatprep.subr.bf16.mxu0 %v2045_v3  ;;  %1019 = vmatprep.subr.bf16.mxu1 %v2047_v4  ;;  %v2132_v3 = vld [vmem:[#allocation8 + $0x384] ss:$16 sps:$4 sm:$0xff]   ;;  %v2135_v4 = vld [vmem:[#allocation8 + $0x38c] ss:$16 sps:$4 sm:$0xff]  }
  0x85   :  { %938 = vmatpush1.bf16.msra.mxu0 %v2049_v6  ;;  %1020 = vmatpush1.bf16.msra.mxu1 %v2050_v7  ;;  %v2133_v6 = vld [vmem:[#allocation8 + $0x388] ss:$16 sps:$4 sm:$0xff]   ;;  %v2138_v7 = vld [vmem:[#allocation8 + $0x3a4] ss:$16 sps:$4 sm:$0xff]  }
  0x86   :  { %939 = vmatprep.subr.bf16.mxu0 %v2051_v8  ;;  %1021 = vmatprep.subr.bf16.mxu1 %v2053_v9  ;;  %v2141_v8 = vld [vmem:[#allocation8 + $0x3ac] ss:$16 sps:$4 sm:$0xff]   ;;  %v2136_v9 = vld [vmem:[#allocation8 + $0x3a0] ss:$16 sps:$4 sm:$0xff]  }
  0x89   :  { %940 = vmatpush1.bf16.msra.mxu0 %v2055_v11  ;;  %1022 = vmatpush1.bf16.msra.mxu1 %v2056_v12  ;;  %v2139_v11 = vld [vmem:[#allocation8 + $0x3a8] ss:$16 sps:$4 sm:$0xff]   ;;  %v2144_v12 = vld [vmem:[#allocation8 + $0x3c4] ss:$16 sps:$4 sm:$0xff]  }
  0x8a   :  { %950 = vmatprep.subr.bf16.mxu0 %v2060_v13  ;;  %1032 = vmatprep.subr.bf16.mxu1 %v2063_v14  ;;  %v2147_v13 = vld [vmem:[#allocation8 + $0x3cc] ss:$16 sps:$4 sm:$0xff]   ;;  %v2142_v14 = vld [vmem:[#allocation8 + $0x3c0] ss:$16 sps:$4 sm:$0xff]  }
  0x8c   :  { %942 = vmatmul.mubr.bf16.vlgmr.msra.gmra.mrb[0].mxu0 %v115_v17  ;;  %1024 = vmatmul.mubr.bf16.vlgmr.msra.gmra.mrb[0].mxu1 %v115_v17  ;;  %v2153_v17 = vld [vmem:[#allocation8 + $0x3ec] ss:$16 sps:$4 sm:$0xff]  }
  0x8d   :  { %951 = vmatpush1.bf16.msra.mxu0 %v2058_v16  ;;  %1033 = vmatpush1.bf16.msra.mxu1 %v2061_v18  ;;  %v2150_v16 = vld [vmem:[#allocation8 + $0x3e4] ss:$16 sps:$4 sm:$0xff]   ;;  %v2148_v18 = vld [vmem:[#allocation8 + $0x3e0] ss:$16 sps:$4 sm:$0xff]  }
  0x8e   :  { %952 = vmatprep.subr.bf16.mxu0 %v2066_v19  ;;  %1034 = vmatprep.subr.bf16.mxu1 %v2069_v20  ;;  %v2151_v19 = vld [vmem:[#allocation8 + $0x3e8] ss:$16 sps:$4 sm:$0xff]   ;;  %v2156_v20 = vld [vmem:[#allocation9 + $0x4] ss:$16 sps:$4 sm:$0xff]  }
  0x8f   :  { %982 = vmatprep.mubr.bf16.mxu0 %v118_v21  ;;  %1064 = vmatprep.mubr.bf16.mxu1 %v118_v21  ;;  %v2159_v21 = vld [vmem:[#allocation9 + $0xc] ss:$16 sps:$4 sm:$0xff]  }
  0x91   :  { %953 = vmatpush1.bf16.msra.mxu0 %v2064_v22  ;;  %1035 = vmatpush1.bf16.msra.mxu1 %v2067_v23  ;;  %v117_v22 = vpack.c.bf16 %v2512_v10, %v2512_v10  ;;  %v2154_v23 = vld [vmem:[#allocation9] ss:$16 sps:$4 sm:$0xff]  }
  0x92   :  { %954 = vmatprep.subr.bf16.mxu0 %v2072_v24  ;;  %1036 = vmatprep.subr.bf16.mxu1 %v2075_v25  ;;  %v2157_v24 = vld [vmem:[#allocation9 + $0x8] ss:$16 sps:$4 sm:$0xff]   ;;  %v2162_v25 = vld [vmem:[#allocation9 + $0x24] ss:$16 sps:$4 sm:$0xff]   ;;  %v2166_v10 = vld [vmem:[#allocation9 + $0x40] ss:$16 sps:$4 sm:$0xff]  }
  0x95   :  { %955 = vmatpush1.bf16.msra.mxu0 %v2070_v26  ;;  %1037 = vmatpush1.bf16.msra.mxu1 %v2073_v27  ;;  %v2165_v26 = vld [vmem:[#allocation9 + $0x2c] ss:$16 sps:$4 sm:$0xff]   ;;  %v2160_v27 = vld [vmem:[#allocation9 + $0x20] ss:$16 sps:$4 sm:$0xff]  }
  0x96   :  { %956 = vmatprep.subr.bf16.mxu0 %v2078_v28  ;;  %1038 = vmatprep.subr.bf16.mxu1 %v2081_v29  ;;  %v2163_v28 = vld [vmem:[#allocation9 + $0x28] ss:$16 sps:$4 sm:$0xff]   ;;  %v2168_v29 = vld [vmem:[#allocation9 + $0x44] ss:$16 sps:$4 sm:$0xff]  }
  0x99   :  { %957 = vmatpush1.bf16.msra.mxu0 %v2076_v30  ;;  %1039 = vmatpush1.bf16.msra.mxu1 %v2079_v31  ;;  %v2171_v30 = vld [vmem:[#allocation9 + $0x4c] ss:$16 sps:$4 sm:$0xff]   ;;  %v2169_v31 = vld [vmem:[#allocation9 + $0x48] ss:$16 sps:$4 sm:$0xff]  }
  0x9a   :  { %958 = vmatprep.subr.bf16.mxu0 %v2084_v32  ;;  %1040 = vmatprep.subr.bf16.mxu1 %v2087_v33  ;;  %v2174_v32 = vld [vmem:[#allocation9 + $0x64] ss:$16 sps:$4 sm:$0xff]   ;;  %v2177_v33 = vld [vmem:[#allocation9 + $0x6c] ss:$16 sps:$4 sm:$0xff]  }
  0x9d   :  { %959 = vmatpush1.bf16.msra.mxu0 %v2082_v34  ;;  %1041 = vmatpush1.bf16.msra.mxu1 %v2085_v35  ;;  %v2172_v34 = vld [vmem:[#allocation9 + $0x60] ss:$16 sps:$4 sm:$0xff]   ;;  %v2175_v35 = vld [vmem:[#allocation9 + $0x68] ss:$16 sps:$4 sm:$0xff]  }
  0x9e   :  { %960 = vmatprep.subr.bf16.mxu0 %v2090_v36  ;;  %1042 = vmatprep.subr.bf16.mxu1 %v2093_v37  ;;  %v2180_v36 = vld [vmem:[#allocation9 + $0x84] ss:$16 sps:$4 sm:$0xff]   ;;  %v2183_v37 = vld [vmem:[#allocation9 + $0x8c] ss:$16 sps:$4 sm:$0xff]  }
  0xa1   :  { %961 = vmatpush1.bf16.msra.mxu0 %v2088_v39  ;;  %1043 = vmatpush1.bf16.msra.mxu1 %v2091_v40  ;;  %v2178_v39 = vld [vmem:[#allocation9 + $0x80] ss:$16 sps:$4 sm:$0xff]   ;;  %v2181_v40 = vld [vmem:[#allocation9 + $0x88] ss:$16 sps:$4 sm:$0xff]  }
  0xa2   :  { %962 = vmatprep.subr.bf16.mxu0 %v2096_v42  ;;  %1044 = vmatprep.subr.bf16.mxu1 %v2099_v43  ;;  %v2186_v42 = vld [vmem:[#allocation9 + $0xa4] ss:$16 sps:$4 sm:$0xff]   ;;  %v2189_v43 = vld [vmem:[#allocation9 + $0xac] ss:$16 sps:$4 sm:$0xff]  }
  0xa5   :  { %963 = vmatpush1.bf16.msra.mxu0 %v2094_v45  ;;  %1045 = vmatpush1.bf16.msra.mxu1 %v2097_v46  ;;  %v2184_v45 = vld [vmem:[#allocation9 + $0xa0] ss:$16 sps:$4 sm:$0xff]   ;;  %v2187_v46 = vld [vmem:[#allocation9 + $0xa8] ss:$16 sps:$4 sm:$0xff]  }
  0xa6   :  { %964 = vmatprep.subr.bf16.mxu0 %v2102_v47  ;;  %1046 = vmatprep.subr.bf16.mxu1 %v2105_v48  ;;  %v2192_v47 = vld [vmem:[#allocation9 + $0xc4] ss:$16 sps:$4 sm:$0xff]   ;;  %v2195_v48 = vld [vmem:[#allocation9 + $0xcc] ss:$16 sps:$4 sm:$0xff]  }
  0xa9   :  { %965 = vmatpush1.bf16.msra.mxu0 %v2100_v49  ;;  %1047 = vmatpush1.bf16.msra.mxu1 %v2103_v50  ;;  %v2190_v49 = vld [vmem:[#allocation9 + $0xc0] ss:$16 sps:$4 sm:$0xff]   ;;  %v2193_v50 = vld [vmem:[#allocation9 + $0xc8] ss:$16 sps:$4 sm:$0xff]  }
  0xaa   :  { %966 = vmatprep.subr.bf16.mxu0 %v2108_v51  ;;  %1048 = vmatprep.subr.bf16.mxu1 %v2111_v52  ;;  %v2198_v51 = vld [vmem:[#allocation9 + $0xe4] ss:$16 sps:$4 sm:$0xff]   ;;  %v2201_v52 = vld [vmem:[#allocation9 + $0xec] ss:$16 sps:$4 sm:$0xff]  }
  0xad   :  { %967 = vmatpush1.bf16.msra.mxu0 %v2106_v53  ;;  %1049 = vmatpush1.bf16.msra.mxu1 %v2109_v54  ;;  %v2196_v53 = vld [vmem:[#allocation9 + $0xe0] ss:$16 sps:$4 sm:$0xff]   ;;  %v2199_v54 = vld [vmem:[#allocation9 + $0xe8] ss:$16 sps:$4 sm:$0xff]  }
  0xae   :  { %968 = vmatprep.subr.bf16.mxu0 %v2114_v55  ;;  %1050 = vmatprep.subr.bf16.mxu1 %v2117_v56  ;;  %v2520_v55 = vld [vmem:[#allocation3] sm:$0xff]  ;;  %v2522_v56 = vld [vmem:[#allocation3 + $0x8] sm:$0xff] }
  0xb1   :  { %969 = vmatpush1.bf16.msra.mxu0 %v2112_v57  ;;  %1051 = vmatpush1.bf16.msra.mxu1 %v2115_v58  ;;  %v1073_v57 = vpack.c.bf16 %v2522_v56, %v2520_v55  ;;  %v2528_v58 = vld [vmem:[#allocation3 + $0x10] sm:$0xff] }
  0xb2   :  { %970 = vmatprep.subr.bf16.mxu0 %v2120_v59  ;;  %1052 = vmatprep.subr.bf16.mxu1 %v2123_v60  ;;  %v2530_v59 = vld [vmem:[#allocation3 + $0x18] sm:$0xff] }
  0xb3   :  { %v1074_v60 = vpack.c.bf16 %v2530_v59, %v2528_v58 }
  0xb5   :  { %971 = vmatpush1.bf16.msra.mxu0 %v2118_v61  ;;  %1053 = vmatpush1.bf16.msra.mxu1 %v2121_v62  ;;  %v2535_v61 = vsub.s32 0, %v2509_v44  ;;  %v2538_v62 = vsub.s32 2, %v2509_v44 }
  0xb6   :  { %972 = vmatprep.subr.bf16.mxu0 %v2126_v63  ;;  %1054 = vmatprep.subr.bf16.mxu1 %v2129_v0  ;;  %v247_v63 = vld [vmem:[%s2670_s3] sm:$0xf]  ;;  %v2398_v0 = vmov 1966171168  }
  0xb9   :  { %973 = vmatpush1.bf16.msra.mxu0 %v2124_v1  ;;  %1055 = vmatpush1.bf16.msra.mxu1 %v2127_v2  ;;  %v1402_v1 = vunpack.c.l.s4 %v2398_v0  ;;  %v2547_v2 = vsub.s32 3, %v2509_v44 }
  0xba   :  { %974 = vmatprep.subr.bf16.mxu0 %v2132_v3  ;;  %1056 = vmatprep.subr.bf16.mxu1 %v2135_v4  ;;  %v252_v3 = vrot.slane %v247_v63, %v2535_v61  ;;  %v260_v4 = vrot.slane %v247_v63, %v2538_v62 }
  0xbd   :  { %975 = vmatpush1.bf16.msra.mxu0 %v2130_v5  ;;  %1057 = vmatpush1.bf16.msra.mxu1 %v2133_v6  ;;  %v1403_v6 = vunpack.c.0.s8 %v1402_v1 }
  0xbe   :  { %976 = vmatprep.subr.bf16.mxu0 %v2138_v7  ;;  %1058 = vmatprep.subr.bf16.mxu1 %v2141_v8  ;;  %v264_v7 = vrot.slane %v247_v63, %v2547_v2 }
  0xc1   :  { %977 = vmatpush1.bf16.msra.mxu0 %v2136_v9  ;;  %1059 = vmatpush1.bf16.msra.mxu1 %v2139_v11 }
  0xc2   :  { %978 = vmatprep.subr.bf16.mxu0 %v2144_v12  ;;  %1060 = vmatprep.subr.bf16.mxu1 %v2147_v13 }
  0xc5   :  { %979 = vmatpush1.bf16.msra.mxu0 %v2142_v14  ;;  %1061 = vmatpush1.bf16.msra.mxu1 %v2145_v15 }
  0xc6   :  { %980 = vmatprep.subr.bf16.mxu0 %v2150_v16  ;;  %1062 = vmatprep.subr.bf16.mxu1 %v2153_v17  ;;  %v1406_v16 = vsub.s32 %v1403_v6, %v2509_v44  ;;  %v1503_v6 = vld [vmem:[%s2673_s6] sm:$0xf] }
  0xc9   :  { %981 = vmatpush1.bf16.msra.mxu0 %v2148_v18  ;;  %1063 = vmatpush1.bf16.msra.mxu1 %v2151_v19 }
  0xca   :  { %1289 = vmatprep.subr.bf16.mxu0 %v2156_v20  ;;  %1342 = vmatprep.subr.bf16.mxu1 %v2159_v21 }
  0xcc   :  { %983 = vmatmul.mubr.bf16.vlgmr.msra.gmra.mrb[0].mxu0 %v117_v22  ;;  %1065 = vmatmul.mubr.bf16.vlgmr.msra.gmra.mrb[0].mxu1 %v117_v22 }
  0xcd   :  { %1290 = vmatpush1.bf16.msra.mxu0 %v2154_v23  ;;  %1343 = vmatpush1.bf16.msra.mxu1 %v2157_v24 }
  0xce   :  { %1291 = vmatprep.subr.bf16.mxu0 %v2162_v25  ;;  %1344 = vmatprep.subr.bf16.mxu1 %v2165_v26 }
  0xcf   :  { %1321 = vmatprep.mubr.bf16.mxu0 %v2397_v41  ;;  %1374 = vmatprep.mubr.bf16.mxu1 %v2397_v41 }
  0xd1   :  { %1292 = vmatpush1.bf16.msra.mxu0 %v2160_v27  ;;  %1345 = vmatpush1.bf16.msra.mxu1 %v2163_v28  ;;  %v1107_v28 = vld [vmem:[%s2672_s5] sm:$0xf] }
  0xd2   :  { %1293 = vmatprep.subr.bf16.mxu0 %v2168_v29  ;;  %1346 = vmatprep.subr.bf16.mxu1 %v2171_v30  ;;  %v1112_v30 = vrot.slane %v1107_v28, %v2535_v61 }
  0xd5   :  { %1294 = vmatpush1.bf16.msra.mxu0 %v2166_v10  ;;  %1347 = vmatpush1.bf16.msra.mxu1 %v2169_v31  ;;  %v2559_v10 = vrot.slane %v1107_v28, %v2538_v62 }
  0xd6   :  { %1295 = vmatprep.subr.bf16.mxu0 %v2174_v32  ;;  %1348 = vmatprep.subr.bf16.mxu1 %v2177_v33  ;;  %v2565_v32 = vrot.slane %v1107_v28, %v2547_v2 }
  0xd9   :  { %1296 = vmatpush1.bf16.msra.mxu0 %v2172_v34  ;;  %1349 = vmatpush1.bf16.msra.mxu1 %v2175_v35 }
  0xda   :  { %1297 = vmatprep.subr.bf16.mxu0 %v2180_v36  ;;  %1350 = vmatprep.subr.bf16.mxu1 %v2183_v37 }
  0xdd   :  { %1298 = vmatpush1.bf16.msra.mxu0 %v2178_v39  ;;  %1351 = vmatpush1.bf16.msra.mxu1 %v2181_v40 }
  0xde   :  { %1299 = vmatprep.subr.bf16.mxu0 %v2186_v42  ;;  %1352 = vmatprep.subr.bf16.mxu1 %v2189_v43 }
  0xe1   :  { %1300 = vmatpush1.bf16.msra.mxu0 %v2184_v45  ;;  %1353 = vmatpush1.bf16.msra.mxu1 %v2187_v46 }
  0xe2   :  { %1301 = vmatprep.subr.bf16.mxu0 %v2192_v47  ;;  %1354 = vmatprep.subr.bf16.mxu1 %v2195_v48 }
  0xe5   :  { %1302 = vmatpush1.bf16.msra.mxu0 %v2190_v49  ;;  %1355 = vmatpush1.bf16.msra.mxu1 %v2193_v50 }
  0xe6   :  { %1303 = vmatprep.subr.bf16.mxu0 %v2198_v51  ;;  %1356 = vmatprep.subr.bf16.mxu1 %v2201_v52 }
  0xe9   :  { %1304 = vmatpush1.bf16.msra.mxu0 %v2196_v53  ;;  %1357 = vmatpush1.bf16.msra.mxu1 %v2199_v54 }
  0xec   :  { %1322 = vmatmul.mubr.bf16.vlgmr.msra.gmra.mrb[4].mxu0 %v1073_v57  ;;  %1375 = vmatmul.mubr.bf16.vlgmr.msra.gmra.mrb[4].mxu1 %v1073_v57 }
  0xed   :  { %1331 = vmatprep.mubr.bf16.mxu0 %v2397_v41  ;;  %1384 = vmatprep.mubr.bf16.mxu1 %v2397_v41  ;;  %v2544_v41 = vsub.s32 1, %v2509_v44 }
  0xef   :  { %v256_v5 = vrot.slane %v247_v63, %v2544_v41  ;;  %v2562_v31 = vrot.slane %v1107_v28, %v2544_v41 }
  0xf4   :  { %1332 = vmatmul.mubr.bf16.gmra.mrb[8].mxu0 %v1074_v60  ;;  %1385 = vmatmul.mubr.bf16.gmra.mrb[8].mxu1 %v1074_v60 }
 0x19f   :  { %v984_v8 = vpop.f32.mrb[0].mxu0  ;;  %v1066_v9 = vpop.f32.mrb[0].mxu1 }
 0x1a0   :  { %v1934_v11 = vadd.f32 %v984_v8, %v252_v3  ;;  %v1936_v12 = vadd.f32 %v1066_v9, %v260_v4  ;;  %v986_v13 = vpop.f32.mrb[1].mxu0  ;;  %v1068_v14 = vpop.f32.mrb[1].mxu1 }
 0x1a1   :  { %v1935_v15 = vadd.f32 %v986_v13, %v256_v5  ;;  %v1937_v17 = vadd.f32 %v1068_v14, %v264_v7  ;;  %v988_v18 = vpop.f32.mrb[2].mxu0  ;;  %v1070_v19 = vpop.f32.mrb[2].mxu1  ;;  %v2583_v14 = vrot.slane %v1503_v6, %v2535_v61 }
 0x1a2   :  { %v989_v20 = vpop.f32.mrb[3].mxu0  ;;  %v1071_v21 = vpop.f32.mrb[3].mxu1 }
 0x1a3   :  { %v1399_v22 = vcombine.low %v1934_v11, %v1935_v15  ;;  %v1400_v23 = vcombine.low %v1936_v12, %v1937_v17 }
 0x1a5   :  { %v1407_v24 = vrot.slane %v1399_v22, %v1406_v16  ;;  %v1414_v25 = vrot.slane %v1400_v23, %v1406_v16 }
 0x1a7   :  { %v1415_v26 = vcombine.low %v1407_v24, %v1414_v25  ;;  %v1416_v27 = vcombine.high %v1407_v24, %v1414_v25 }
 0x1a9   :  { %v1423_v29 = vrot.slane %v1415_v26, %v1406_v16  ;;  %v1430_v33 = vrot.slane %v1416_v27, %v1406_v16 }
 0x1ab   :  { %v1434_v37 = vrot.slane %v1423_v29, %v2535_v61  ;;  %v1442_v40 = vrot.slane %v1423_v29, %v2538_v62  ;;  %v1438_v46 = vrot.slane %v1423_v29, %v2544_v41  ;;  %v1446_v48 = vrot.slane %v1423_v29, %v2547_v2 }
 0x1ac   :  { %v1450_v11 = vrot.slane %v1430_v33, %v2535_v61  ;;  %v1458_v13 = vrot.slane %v1430_v33, %v2538_v62  ;;  %v1454_v18 = vrot.slane %v1430_v33, %v2544_v41  ;;  %v1462_v22 = vrot.slane %v1430_v33, %v2547_v2 }
 0x1bf   :  { %v1323_v34 = vpop.f32.mrb[4].mxu0  ;;  %v1376_v35 = vpop.f32.mrb[4].mxu1 }
 0x1c0   :  { %v1324_v36 = vadd.f32 %v1323_v34, %v1112_v30  ;;  %v1377_v39 = vadd.f32 %v1376_v35, %v2559_v10  ;;  %v1325_v42 = vpop.f32.mrb[5].mxu0  ;;  %v1378_v43 = vpop.f32.mrb[5].mxu1 }
 0x1c1   :  { %v1326_v45 = vadd.f32 %v1325_v42, %v2562_v31  ;;  %v1379_v47 = vadd.f32 %v1378_v43, %v2565_v32  ;;  %v1327_v49 = vpop.f32.mrb[6].mxu0  ;;  %v1380_v50 = vpop.f32.mrb[6].mxu1  ;;  %v1512_v42 = vrot.slane %v1503_v6, %v2544_v41 }
 0x1c2   :  { %v1471_v51 = vadd.f32 %v1434_v37, %v1324_v36  ;;  %v1473_v52 = vadd.f32 %v1442_v40, %v1377_v39  ;;  %v1328_v53 = vadd.f32 %v1327_v49, %v1112_v30  ;;  %v1381_v54 = vadd.f32 %v1380_v50, %v2559_v10  ;;  %v1329_v57 = vpop.f32.mrb[7].mxu0  ;;  %v1382_v60 = vpop.f32.mrb[7].mxu1 }
 0x1c3   :  { %v1472_v63 = vadd.f32 %v1438_v46, %v1326_v45  ;;  %v1474_v0 = vadd.f32 %v1446_v48, %v1379_v47  ;;  %v1330_v1 = vadd.f32 %v1329_v57, %v2562_v31  ;;  %v1383_v3 = vadd.f32 %v1382_v60, %v2565_v32 }
 0x1c4   :  { %2202 = vtanh.f32 %v1471_v51  ;;  %v1475_v4 = vadd.f32 %v1434_v37, %v1328_v53  ;;  %v1477_v5 = vadd.f32 %v1442_v40, %v1381_v54  ;;  %v1516_v47 = vrot.slane %v1503_v6, %v2538_v62 }
 0x1c5   :  { %2204 = vtanh.f32 %v1473_v52  ;;  %v1476_v7 = vadd.f32 %v1438_v46, %v1330_v1  ;;  %v1478_v8 = vadd.f32 %v1446_v48, %v1383_v3 }
 0x1c6   :  { %2206 = vtanh.f32 %v1472_v63 }
 0x1c7   :  { %2208 = vtanh.f32 %v1474_v0  ;;  %v1333_v9 = vpop.f32.mrb[8].mxu0  ;;  %v1386_v12 = vpop.f32.mrb[8].mxu1 }
 0x1c8   :  { %2210 = vtanh.f32 %v1475_v4  ;;  %v1334_v15 = vadd.f32 %v1333_v9, %v1112_v30  ;;  %v1387_v16 = vadd.f32 %v1386_v12, %v2559_v10  ;;  %v1335_v17 = vpop.f32.mrb[9].mxu0  ;;  %v1388_v19 = vpop.f32.mrb[9].mxu1 }
 0x1c9   :  { %2212 = vtanh.f32 %v1477_v5  ;;  %v1336_v20 = vadd.f32 %v1335_v17, %v2562_v31  ;;  %v1389_v21 = vadd.f32 %v1388_v19, %v2565_v32  ;;  %v1337_v23 = vpop.f32.mrb[10].mxu0  ;;  %v1390_v24 = vpop.f32.mrb[10].mxu1 }
 0x1ca   :  { %2214 = vtanh.f32 %v1476_v7  ;;  %v1479_v25 = vadd.f32 %v1450_v11, %v1334_v15  ;;  %v1481_v26 = vadd.f32 %v1458_v13, %v1387_v16  ;;  %v1338_v27 = vadd.f32 %v1337_v23, %v1112_v30  ;;  %v1339_v28 = vpop.f32.mrb[11].mxu0  ;;  %v1392_v29 = vpop.f32.mrb[11].mxu1 }
 0x1cb   :  { %2216 = vtanh.f32 %v1478_v8  ;;  %v1480_v34 = vadd.f32 %v1454_v18, %v1336_v20  ;;  %v1482_v35 = vadd.f32 %v1462_v22, %v1389_v21  ;;  %v1391_v36 = vadd.f32 %v1390_v24, %v2559_v10 }
 0x1cc   :  { %2218 = vtanh.f32 %v1479_v25  ;;  %v1483_v37 = vadd.f32 %v1450_v11, %v1338_v27  ;;  %v1340_v39 = vadd.f32 %v1339_v28, %v2562_v31  ;;  %v1393_v40 = vadd.f32 %v1392_v29, %v2565_v32 }
 0x1cd   :  { %2220 = vtanh.f32 %v1481_v26  ;;  %v1485_v33 = vadd.f32 %v1458_v13, %v1391_v36  ;;  %v1520_v31 = vrot.slane %v1503_v6, %v2547_v2  ;;  %v1572_v36 = vand.u32 127, %v98_v38 }
 0x1ce   :  { %v2203_v43 = vpop.eup %2202  ;;  %2222 = vtanh.f32 %v1480_v34  ;;  %v1484_v30 = vadd.f32 %v1454_v18, %v1340_v39  ;;  %v1486_v45 = vadd.f32 %v1462_v22, %v1393_v40 }
 0x1cf   :  { %v2205_v46 = vpop.eup %2204  ;;  %2224 = vtanh.f32 %v1482_v35  ;;  %v1525_v10 = vmul.f32 %v2203_v43, %v2583_v14  ;;  %v2608_v43 = vsub.s32 %v1572_v36, %v2509_v44 }
 0x1d0   :  { %v2207_v48 = vpop.eup %2206  ;;  %2226 = vtanh.f32 %v1483_v37  ;;  %v1527_v52 = vmul.f32 %v2205_v46, %v1516_v47  ;;  %v1577_v37 = vadd.s32 4294967288, %v1572_v36 }
 0x1d1   :  { %v2209_v49 = vpop.eup %2208  ;;  %2228 = vtanh.f32 %v1485_v33  ;;  %v1526_v32 = vmul.f32 %v2207_v48, %v1512_v42 }
 0x1d2   :  { %v2211_v50 = vpop.eup %2210  ;;  %2230 = vtanh.f32 %v1484_v30  ;;  %v1528_v62 = vmul.f32 %v2209_v49, %v1520_v31  ;;  %v2605_v33 = vsub.s32 %v1577_v37, %v2509_v44 }
 0x1d3   :  { %v2213_v51 = vpop.eup %2212  ;;  %v1541_v53 = vadd.f32 %v1526_v32, %v1525_v10  ;;  %v1529_v54 = vmul.f32 %v2211_v50, %v2583_v14  ;;  %2232 = vtanh.f32 %v1486_v45 }
 0x1d4   :  { %v2215_v57 = vpop.eup %2214  ;;  %v1531_v5 = vmul.f32 %v2213_v51, %v1516_v47 }
 0x1d5   :  { %v2217_v60 = vpop.eup %2216  ;;  %v1542_v63 = vadd.f32 %v1541_v53, %v1527_v52  ;;  %v1530_v0 = vmul.f32 %v2215_v57, %v1512_v42 }
 0x1d6   :  { %v2219_v1 = vpop.eup %2218  ;;  %v1532_v9 = vmul.f32 %v2217_v60, %v1520_v31 }
 0x1d7   :  { %v2221_v3 = vpop.eup %2220  ;;  %v1543_v4 = vadd.f32 %v1542_v63, %v1528_v62  ;;  %v1546_v7 = vadd.f32 %v1530_v0, %v1529_v54  ;;  %v1533_v2 = vmul.f32 %v2219_v1, %v2583_v14 }
 0x1d8   :  { %v2223_v6 = vpop.eup %2222  ;;  %v1535_v17 = vmul.f32 %v2221_v3, %v1516_v47 }
 0x1d9   :  { %v2225_v8 = vpop.eup %2224  ;;  %1544 = vadd.xlane.f32.xlu0 %v1543_v4  ;;  %v1547_v11 = vadd.f32 %v1546_v7, %v1531_v5  ;;  %v1534_v12 = vmul.f32 %v2223_v6, %v1512_v42 }
 0x1da   :  { %v2227_v13 = vpop.eup %2226  ;;  %v1536_v21 = vmul.f32 %v2225_v8, %v1520_v31 }
 0x1db   :  { %v2229_v15 = vpop.eup %2228  ;;  %v1548_v16 = vadd.f32 %v1547_v11, %v1532_v9  ;;  %v1551_v18 = vadd.f32 %v1534_v12, %v1533_v2  ;;  %v1537_v19 = vmul.f32 %v2227_v13, %v2583_v14  ;;  %v1562_v14 = vstv %s2674_s7  ;;  %s2399_s7 = smov [#allocation12]  }
 0x1dc   :  { %v2231_v20 = vpop.eup %2230  ;;  %v1539_v26 = vmul.f32 %v2229_v15, %v1516_v47  ;;  %s1759_s20 = sshll.u32 %s2399_s7, 4  ;;  %s1760_s20 = int_to_ptr.vmem [resolvable:$true] %s1759_s20 }
 0x1dd   :  { %1549 = vadd.xlane.f32.xlu0 %v1548_v16  ;;  %v1552_v22 = vadd.f32 %v1551_v18, %v1535_v17  ;;  %v1538_v23 = vmul.f32 %v2231_v20, %v1512_v42  ;;  %v2233_v24 = vpop.eup %2232  ;;  %s2334_s21 = scalar_lea.vmem %s1760_s20, 32  ;;  %p2339_p5 = scmp.lt.s32.totalorder %s1760_s20, %s1760_s20 }
 0x1de   :  { %v1540_v28 = vmul.f32 %v2233_v24, %v1520_v31  ;;  %p2335_p4 = scmp.ne.s32.totalorder %s1760_s20, %s2334_s21  ;;  %p2340_p6 = scmp.lt.s32.totalorder %s2334_s21, %s2334_s21 }
 0x1df   :  { %v1553_v25 = vadd.f32 %v1552_v22, %v1536_v21  ;;  %v1556_v27 = vadd.f32 %v1538_v23, %v1537_v19 }
 0x1e0   :  { %p2341_p7 = por %p2340_p6, %p2339_p5 }
 0x1e1   :  { %1554 = vadd.xlane.f32.xlu1 %v1553_v25  ;;  %v1557_v29 = vadd.f32 %v1556_v27, %v1539_v26 }
 0x1e2   :  { %p2342_p8 = pnand %p2341_p7, %p2335_p4 }
 0x1e3   :  { %v1558_v34 = vadd.f32 %v1557_v29, %v1540_v28 }
 0x1e5   :  { %1559 = vadd.xlane.f32.xlu1 %v1558_v34 }
 0x266   :  { %v1545_v35 = vpop.xlane.xlu0 %1544 }
 0x267   :  { %v1563_v30 = vadd.f32 %v1562_v14, %v1545_v35 }
 0x269   :  { %v1576_v10 = vrot.slane %v1563_v30, %v2608_v43 }
 0x26a   :  { %v1550_v39 = vpop.xlane.xlu0 %1549 }
 0x26b   :  { %v1564_v42 = vadd.f32 %v1562_v14, %v1550_v39 }
 0x26d   :  { %v1581_v47 = vrot.slane %v1564_v42, %v2605_v33 }
 0x26e   :  { %v1555_v40 = vpop.xlane.xlu1 %1554 }
 0x26f   :  { %v1565_v45 = vadd.f32 %v1562_v14, %v1555_v40  ;;  %v1583_v31 = vsel %vm1582_vm0, %v1581_v47, %v1576_v10 }
 0x271   :  { %v1587_v48 = vrot.slane %v1565_v45, %v2608_v43 }
 0x272   :  { %v1560_v46 = vpop.xlane.xlu1 %1559 }
 0x273   :  { %v1566_v38 = vadd.f32 %v1562_v14, %v1560_v46 }
 0x275   :  { %v1591_v49 = vrot.slane %v1566_v38, %v2605_v33 }
 0x277   :  { %v1592_v44 = vsel %vm1582_vm0, %v1591_v49, %v1587_v48 }
 0x278   :  { %v1594_v32 = vsel %vm1593_vm1, %v1592_v44, %v1583_v31 }
 0x279   :  { %v1597_v50 = vsel %vm1596_vm2, %v1594_v32, -inf }
 0x27a   :  { %1598 = vmax.xlane.f32.xlu0 %v1597_v50 }
 0x307   :  { %v1599_v51 = vpop.xlane.xlu0 %1598 }
 0x308   :  { %v1604_v52 = vrot.slane %v1599_v51, %v2535_v61  ;;  %v1608_v53 = vrot.slane %v1599_v51, %v2544_v41 }
 0x30a   :  { %v1611_v54 = vsub.f32 %v1563_v30, %v1604_v52  ;;  %v1612_v57 = vsub.f32 %v1564_v42, %v1604_v52  ;;  %v1613_v60 = vsub.f32 %v1565_v45, %v1608_v53  ;;  %v1614_v0 = vsub.f32 %v1566_v38, %v1608_v53 }
 0x30c   :  { %v1615_v62 = vmul.f32 1.442695, %v1611_v54  ;;  %v1617_v63 = vmul.f32 1.442695, %v1612_v57  ;;  %v1619_v1 = vmul.f32 1.442695, %v1613_v60 }
 0x30d   :  { %v1621_v3 = vmul.f32 1.442695, %v1614_v0 }
 0x30e   :  { %2234 = vpow2.f32 %v1615_v62 }
 0x30f   :  { %2236 = vpow2.f32 %v1617_v63 }
 0x310   :  { %2238 = vpow2.f32 %v1619_v1 }
 0x311   :  { %2240 = vpow2.f32 %v1621_v3 }
 0x318   :  { %v2235_v4 = vpop.eup %2234 }
 0x319   :  { %v2237_v5 = vpop.eup %2236  ;;  %1628 = vperm.xlu1 %1959, %v2235_v4  }
 0x31a   :  { %1631 = vperm.xlu0 %1960, %v2237_v5   ;;  %v2239_v7 = vpop.eup %2238 }
 0x31b   :  { %v2241_v2 = vpop.eup %2240 }
 0x31d   :  { %1634 = vperm.xlu1 %1959, %v2239_v7  }
 0x321   :  { %1637 = vperm.xlu1 %1959, %v2241_v2  }
 0x398   :  { %v1629_v6 = vpop.permute.xlu1 %1628 }
 0x399   :  { %v1632_v8 = vpop.permute.xlu0 %1631  ;;  %v1642_v12 = vrot.slane %v1629_v6, %v2608_v43 }
 0x39a   :  { %v1646_v11 = vrot.slane %v1632_v8, %v2605_v33 }
 0x39c   :  { %v1635_v9 = vpop.permute.xlu1 %1634  ;;  %v1647_v17 = vsel %vm1582_vm0, %v1646_v11, %v1642_v12 }
 0x39d   :  { %v1651_v15 = vrot.slane %v1635_v9, %v2608_v43 }
 0x3a0   :  { %v1638_v13 = vpop.permute.xlu1 %1637 }
 0x3a1   :  { %v1655_v16 = vrot.slane %v1638_v13, %v2605_v33 }
 0x3a3   :  { %v1656_v18 = vsel %vm1582_vm0, %v1655_v16, %v1651_v15 }
 0x3a4   :  { %v1657_v19 = vsel %vm1593_vm1, %v1656_v18, %v1647_v17 }
 0x3a5   :  { %v1659_v20 = vsel %vm1596_vm2, %v1657_v19, 0.0 }
 0x3a6   :  { %1660 = vadd.xlane.f32.xlu1 %v1659_v20 }
 0x433   :  { %v1661_v21 = vpop.xlane.xlu1 %1660 }
 0x434   :  { %v1666_v22 = vrot.slane %v1661_v21, %v2535_v61  ;;  %v1670_v23 = vrot.slane %v1661_v21, %v2544_v41 }
 0x436   :  { %2242 = vrcp.f32 %v1666_v22 }
 0x437   :  { %2244 = vrcp.f32 %v1670_v23 }
 0x440   :  { %v2243_v24 = vpop.eup %2242 }
 0x441   :  { %v1674_v25 = vmul.f32 %v2243_v24, %v2235_v4  ;;  %v1675_v26 = vmul.f32 %v2243_v24, %v2237_v5  ;;  %v2245_v27 = vpop.eup %2244 }
 0x442   :  { %v1677_v28 = vmul.f32 %v2245_v27, %v2239_v7  ;;  %v1678_v29 = vmul.f32 %v2245_v27, %v2241_v2 }
 0x443   :  { %1681 = vperm.xlu0 %1960, %v1674_v25  }
 0x447   :  { %1686 = vperm.xlu0 %1960, %v1675_v26  }
 0x44b   :  { %1691 = vperm.xlu0 %1960, %v1677_v28  }
 0x44f   :  { %1696 = vperm.xlu0 %1960, %v1678_v29  }
 0x4c2   :  { %v1682_v34 = vpop.permute.xlu0 %1681 }
 0x4c3   :  { %v1699_v36 = vmul.f32 %v1682_v34, %v2520_v55  ;;  %v1725_v42 = vrot.slane %v1682_v34, %v2608_v43 }
 0x4c6   :  { %v1687_v35 = vpop.permute.xlu0 %1686 }
 0x4c7   :  { %v1700_v61 = vmul.f32 %v1687_v35, %v2522_v56  ;;  %v1729_v40 = vrot.slane %v1687_v35, %v2605_v33 }
 0x4c9   :  { %v1703_v37 = vadd.f32 %v1700_v61, %v1699_v36  ;;  %v1730_v48 = vsel %vm1582_vm0, %v1729_v40, %v1725_v42 }
 0x4ca   :  { %v1692_v39 = vpop.permute.xlu0 %1691 }
 0x4cb   :  { %v1704_v41 = vrot.slane %v1703_v37, 4  ;;  %v1701_v45 = vmul.f32 %v1692_v39, %v2528_v58  ;;  %v1734_v46 = vrot.slane %v1692_v39, %v2608_v43 }
 0x4cd   :  { %v1705_v14 = vadd.f32 %v1704_v41, %v1703_v37 }
 0x4ce   :  { %v1697_v30 = vpop.permute.xlu0 %1696 }
 0x4cf   :  { %v1702_v47 = vmul.f32 %v1697_v30, %v2530_v59  ;;  %v1738_v55 = vrot.slane %v1697_v30, %v2605_v33  ;;  %v1706_v56 = vrot.slane %v1705_v14, 2 }
 0x4d1   :  { %v1710_v38 = vadd.f32 %v1702_v47, %v1701_v45  ;;  %v1739_v10 = vsel %vm1582_vm0, %v1738_v55, %v1734_v46 }
 0x4d2   :  { %v1740_v49 = vsel %vm1593_vm1, %v1739_v10, %v1730_v48 }
 0x4d3   :  { %v1711_v31 = vrot.slane %v1710_v38, 4  ;;  %1742 = vst.msk [vmem:[#allocation12] sm:$0x3] %vm1596_vm2, %v1740_v49 }
 0x4d4   :  { %2345 = shalt.err (!%p2342_p8)
}
 0x4d5   :  { %s2346_s0 = scalar_lea.hbm %s2676_s9, 32 }
 0x4d6   :  { %p2347_p9 = scmp.ne.s32.totalorder %s2676_s9, %s2346_s0  ;;  %p2350_p10 = scmp.lt.u32.totalorder %s2346_s0, %s2676_s9 }
 0x4d8   :  { %p2352_p11 = pnand %p2350_p10, %p2347_p9 }
 0x4da   :  { %2355 = shalt.err (!%p2352_p11)
}
 0x4db   :  { %1762 = dma.vmem_to_hbm [thread:$0]  %s1760_s20, 32, %s2676_s9, [#allocation13]   ;;  %v1707_v58 = vadd.f32 %v1706_v56, %v1705_v14  ;;  %v1712_v59 = vadd.f32 %v1711_v31, %v1710_v38 }
 0x4dc   :  { %s2400_s29 = smov [#allocation11]  }
 0x4dd   :  { %v1713_v33 = vrot.slane %v1712_v59, 2  ;;  %v1708_v44 = vrot.slane %v1707_v58, 1  ;;  %s1749_s30 = sshll.u32 %s2400_s29, 4  ;;  %s1750_s30 = int_to_ptr.vmem [resolvable:$true] %s1749_s30 }
 0x4de   :  { %s2356_s1 = scalar_lea.vmem %s1750_s30, 32  ;;  %p2361_p13 = scmp.lt.s32.totalorder %s1750_s30, %s1750_s30 }
 0x4df   :  { %v1714_v43 = vadd.f32 %v1713_v33, %v1712_v59  ;;  %v1709_v50 = vadd.f32 %v1708_v44, %v1707_v58  ;;  %p2357_p12 = scmp.ne.s32.totalorder %s1750_s30, %s2356_s1  ;;  %p2362_p0 = scmp.lt.s32.totalorder %s2356_s1, %s2356_s1 }
 0x4e1   :  { %v1715_v32 = vrot.slane %v1714_v43, 1  ;;  %p2363_p1 = por %p2362_p0, %p2361_p13 }
 0x4e3   :  { %v1716_v51 = vadd.f32 %v1715_v32, %v1714_v43  ;;  %p2364_p2 = pnand %p2363_p1, %p2357_p12 }
 0x4e5   :  { %v1719_v52 = vsel %vm1593_vm1, %v1716_v51, %v1709_v50 }
 0x4e6   :  { %1721 = vst [vmem:[#allocation11] sm:$0x3] %v1719_v52 }
 0x4e7   :  { %2367 = shalt.err (!%p2364_p2)
}
 0x4e8   :  { %s2368_s11 = scalar_lea.hbm %s2675_s8, 32 }
 0x4e9   :  { %p2369_p3 = scmp.ne.s32.totalorder %s2675_s8, %s2368_s11  ;;  %p2372_p4 = scmp.lt.u32.totalorder %s2368_s11, %s2675_s8 }
 0x4eb   :  { %p2374_p5 = pnand %p2372_p4, %p2369_p3 }
 0x4ed   :  { %2377 = shalt.err (!%p2374_p5)
}
 0x4ee   :  { %1752 = dma.vmem_to_hbm [thread:$0]  %s1750_s30, 32, %s2675_s8, [#allocation5]  }
 0x4ef   :  { %2384 = dma.done.wait [#allocation5], 32  }
 0x4f0   :  { %2385 = vsyncadd [#allocation5], 4294967264 }
 0x4f1   :  { %2386 = dma.done.wait [#allocation13], 32  }
 0x4f2   :  { %2387 = vsyncadd [#allocation13], 4294967264 }
 0x4f3   :  { %1769 = vsyncpa [#allocation4], 1 }
 0x4f4   :  { %1770 = vsyncpa [#allocation7], 1 }
 0x4f5   :  { %1771 = vsyncpa [#allocation10], 1 }
 0x4f6   :  { %1772 = vsyncpa [#allocation5], 1 }
 0x4f7   :  { %1773 = vsyncpa [#allocation13], 1 }

</bundles_post_ra>
